<compile_context>
chip_gen: v5e
topology: v5e:2x2
jax: 0.10.0
libtpu: 0.0.40
codegen_flags: <defaults>
</compile_context>

<pallas_src>
import math
import jax
import jax.numpy as jnp
from jax import lax
from jax.experimental import pallas as pl
from jax.experimental.pallas import tpu as pltpu

# ---- hyperparameters (small, consistent with the module's forward) ----
B = 2           # batch
T = 8           # sequence length (== block_size)
N_EMB = 32      # C
HEAD_SIZE = 16  # head_size
DROPOUT = 0.0   # TODO(synk): dropout on attention weights is identity at p=0 /
                # eval mode; training-time RNG dropout not implemented here.


def head_kernel(x_ref, wqkv_ref, o_ref):
    b, t, c = x_ref.shape
    h = o_ref.shape[-1]

    # Plain Python floats -> embedded as immediates, never captured constants.
    neg_big = -1e30                # finite "-inf" (robust if a row were masked)
    scale = float(c) ** 0.5        # PyTorch module scales by C**0.5 (not 1/sqrt)

    # ---- fused QKV projection: one (B*T, C) @ (C, 3H) MXU pass ----
    x2d = x_ref[...].reshape(b * t, c)                       # (B*T, C)
    qkv = jnp.dot(x2d, wqkv_ref[...],
                  preferred_element_type=jnp.float32)        # (B*T, 3H)

    k = qkv[:, 0:h].reshape(b, t, h)
    q = qkv[:, h:2 * h].reshape(b, t, h)
    v = qkv[:, 2 * h:3 * h].reshape(b, t, h)

    # ---- attention scores: contract over H, batched over B (no explicit k.T) ----
    wei = lax.dot_general(
        q, k, dimension_numbers=(((2,), (2,)), ((0,), (0,))),
        preferred_element_type=jnp.float32) * scale          # (B, T, T)

    # ---- causal (lower-triangular) mask, built once, broadcast over batch ----
    row = lax.broadcasted_iota(jnp.int32, (t, t), 0)
    col = lax.broadcasted_iota(jnp.int32, (t, t), 1)
    wei = jnp.where((col <= row)[None, :, :], wei, neg_big)

    # ---- numerically stable softmax over last axis ----
    m = jnp.max(wei, axis=-1, keepdims=True)
    p = jnp.exp(wei - m)
    denom = jnp.sum(p, axis=-1, keepdims=True)
    wei = p * pl.reciprocal(denom, approx=True)              # EUP vrcp (free slot)

    # ---- weighted sum of values; single dense (B, T, H) store ----
    out = lax.dot_general(
        wei, v, dimension_numbers=(((2,), (1,)), ((0,), (0,))),
        preferred_element_type=jnp.float32)                  # (B, T, H)
    o_ref[...] = out.astype(o_ref.dtype)


def head_forward(x, w_key, w_query, w_value):
    """x: (B, T, C) fp32; w_*: PyTorch-layout (H, C) weights (no bias)."""
    Bx, Tx, Cx = x.shape
    H = w_key.shape[0]
    # fuse the three projections into one (C, 3H) weight, order [K | Q | V]
    wqkv = jnp.concatenate([w_key.T, w_query.T, w_value.T], axis=1)
    return pl.pallas_call(
        head_kernel,
        out_shape=jax.ShapeDtypeStruct((Bx, Tx, H), x.dtype),
        in_specs=[
            pl.BlockSpec(memory_space=pltpu.MemorySpace.VMEM),  # x, whole array
            pl.BlockSpec(memory_space=pltpu.MemorySpace.VMEM),  # fused wqkv
        ],
        out_specs=pl.BlockSpec(memory_space=pltpu.MemorySpace.VMEM),
    )(x, wqkv)


def head_reference(x, w_key, w_query, w_value):
    """Pure-JAX reference mirroring the PyTorch forward exactly."""
    Bx, Tx, Cx = x.shape
    k = x @ w_key.T
    q = x @ w_query.T
    v = x @ w_value.T
    wei = (q @ jnp.swapaxes(k, -2, -1)) * (Cx ** 0.5)
    tril = jnp.tril(jnp.ones((Tx, Tx)))
    wei = jnp.where(tril == 0, -jnp.inf, wei)
    wei = jax.nn.softmax(wei, axis=-1)
    return wei @ v


if __name__ == "__main__":
    key = jax.random.PRNGKey(0)
    kx, kk, kq, kv = jax.random.split(key, 4)

    x = jax.random.normal(kx, (B, T, N_EMB), dtype=jnp.float32)
    # deterministic nn.Linear-style init (uniform in +-1/sqrt(fan_in)), PyTorch layout (H, C)
    bound = 1.0 / math.sqrt(N_EMB)
    w_key = jax.random.uniform(kk, (HEAD_SIZE, N_EMB), jnp.float32, -bound, bound)
    w_query = jax.random.uniform(kq, (HEAD_SIZE, N_EMB), jnp.float32, -bound, bound)
    w_value = jax.random.uniform(kv, (HEAD_SIZE, N_EMB), jnp.float32, -bound, bound)

    out = head_forward(x, w_key, w_query, w_value)
    out = jax.block_until_ready(out)

    ref = head_reference(x, w_key, w_query, w_value)
    assert out.shape == (B, T, HEAD_SIZE)
    # tolerance loosened slightly for the approximate (EUP) reciprocal in softmax
    assert jnp.allclose(out, ref, atol=2e-3, rtol=2e-3), "mismatch vs reference"

    print("KERNEL_OK")
</pallas_src>

<mosaic_0001>
module attributes {stable_mosaic.version = 11 : i64} {
  func.func @head_kernel(%arg0: memref<2x8x32xf32, #tpu.memory_space<vmem>>, %arg1: memref<32x48xf32, #tpu.memory_space<vmem>>, %arg2: memref<2x8x16xf32, #tpu.memory_space<vmem>>) attributes {dimension_semantics = [], scalar_prefetch = 0 : i64, scratch_operands = 0 : i64, tpu.core_type = #tpu.core_type<tc>} {
    %c0 = arith.constant 0 : index
    %c0_0 = arith.constant 0 : index
    %c0_1 = arith.constant 0 : index
    %0 = vector.load %arg0[%c0, %c0_0, %c0_1] : memref<2x8x32xf32, #tpu.memory_space<vmem>>, vector<2x8x32xf32>
    %1 = vector.shape_cast %0 : vector<2x8x32xf32> to vector<16x32xf32>
    %c0_2 = arith.constant 0 : index
    %c0_3 = arith.constant 0 : index
    %2 = vector.load %arg1[%c0_2, %c0_3] : memref<32x48xf32, #tpu.memory_space<vmem>>, vector<32x48xf32>
    %cst = arith.constant dense<0.000000e+00> : vector<16x48xf32>
    %3 = tpu.matmul %1, %2, %cst {dimension_numbers = #tpu.dot_dimension_numbers<[1], [0], [0], [1], [0, 0, 1, 1], [], []>} : vector<16x32xf32>, vector<32x48xf32>, vector<16x48xf32> -> vector<16x48xf32>
    %4 = vector.extract_strided_slice %3 {offsets = [0, 0], sizes = [16, 16], strides = [1, 1]} : vector<16x48xf32> to vector<16x16xf32>
    %5 = vector.shape_cast %4 : vector<16x16xf32> to vector<2x8x16xf32>
    %6 = vector.extract_strided_slice %3 {offsets = [0, 16], sizes = [16, 16], strides = [1, 1]} : vector<16x48xf32> to vector<16x16xf32>
    %7 = vector.shape_cast %6 : vector<16x16xf32> to vector<2x8x16xf32>
    %8 = vector.extract_strided_slice %3 {offsets = [0, 32], sizes = [16, 16], strides = [1, 1]} : vector<16x48xf32> to vector<16x16xf32>
    %9 = vector.shape_cast %8 : vector<16x16xf32> to vector<2x8x16xf32>
    %cst_4 = arith.constant dense<0.000000e+00> : vector<2x8x8xf32>
    %10 = tpu.matmul %7, %5, %cst_4 {dimension_numbers = #tpu.dot_dimension_numbers<[2], [2], [1], [1], [0, 0, 0, 1, 1, 1], [0], [0]>} : vector<2x8x16xf32>, vector<2x8x16xf32>, vector<2x8x8xf32> -> vector<2x8x8xf32>
    %cst_5 = arith.constant 5.65685415 : f32
    %11 = vector.broadcast %cst_5 : f32 to vector<2x8x8xf32>
    %12 = arith.mulf %10, %11 : vector<2x8x8xf32>
    %13 = tpu.iota {dimensions = array<i32: 0>} : vector<8x8xi32>
    %14 = tpu.iota {dimensions = array<i32: 1>} : vector<8x8xi32>
    %15 = arith.cmpi sle, %14, %13 : vector<8x8xi32>
    %16 = vector.shape_cast %15 : vector<8x8xi1> to vector<1x8x8xi1>
    %cst_6 = arith.constant -1.000000e+30 : f32
    %17 = vector.shape_cast %16 : vector<1x8x8xi1> to vector<1x8x8xi1>
    %18 = vector.broadcast %17 : vector<1x8x8xi1> to vector<2x8x8xi1>
    %19 = vector.broadcast %cst_6 : f32 to vector<2x8x8xf32>
    %20 = arith.select %18, %12, %19 : vector<2x8x8xi1>, vector<2x8x8xf32>
    %cst_7 = arith.constant dense<0xFF800000> : vector<2x8xf32>
    %21 = vector.multi_reduction <maximumf>, %20, %cst_7 [2] : vector<2x8x8xf32> to vector<2x8xf32>
    %22 = vector.shape_cast %21 : vector<2x8xf32> to vector<2x8x1xf32>
    %23 = vector.broadcast %22 : vector<2x8x1xf32> to vector<2x8x8xf32>
    %24 = arith.subf %20, %23 : vector<2x8x8xf32>
    %25 = math.exp %24 : vector<2x8x8xf32>
    %cst_8 = arith.constant dense<0.000000e+00> : vector<2x8xf32>
    %26 = vector.multi_reduction <add>, %25, %cst_8 [2] : vector<2x8x8xf32> to vector<2x8xf32>
    %27 = vector.shape_cast %26 : vector<2x8xf32> to vector<2x8x1xf32>
    %28 = tpu.reciprocal %27 {approx = true} : vector<2x8x1xf32> -> vector<2x8x1xf32>
    %29 = vector.broadcast %28 : vector<2x8x1xf32> to vector<2x8x8xf32>
    %30 = arith.mulf %25, %29 : vector<2x8x8xf32>
    %cst_9 = arith.constant dense<0.000000e+00> : vector<2x8x16xf32>
    %31 = tpu.matmul %30, %9, %cst_9 {dimension_numbers = #tpu.dot_dimension_numbers<[2], [1], [1], [2], [0, 0, 0, 1, 1, 2], [0], [0]>} : vector<2x8x8xf32>, vector<2x8x16xf32>, vector<2x8x16xf32> -> vector<2x8x16xf32>
    %c0_10 = arith.constant 0 : index
    %c0_11 = arith.constant 0 : index
    %c0_12 = arith.constant 0 : index
    %32 = vector.load %arg2[%c0_10, %c0_11, %c0_12] : memref<2x8x16xf32, #tpu.memory_space<vmem>>, vector<2x8x16xf32>
    tpu.vector_store %arg2[%c0_10, %c0_11, %c0_12], %31 {strides = array<i32>} : memref<2x8x16xf32, #tpu.memory_space<vmem>>, vector<2x8x16xf32>,
    return
  }
}

</mosaic_0001>

<bundles_post_ra>
// kernel: tpu_custom_call.1
= control target key start
LH: loop header
LB: loop body
LE: loop exit
PB: predicated region body
PF: predicated region fallthrough
CT: control target
= control target key end

     0   :  { %7 = vsyncpa [#allocation3], 0  ;;  %s396_s0 = inlined_call_operand.hbm [shape: f32[2,8,32], index: 0, kind: input, shape index: {}]   ;;  %s397_s1 = inlined_call_operand.hbm [shape: f32[32,48], index: 1, kind: input, shape index: {}]   ;;  %s398_s2 = inlined_call_operand.hbm [shape: f32[2,8,16], index: 2, kind: output, shape index: {}]  }
   0x1   :  { %8 = vsyncpa [#allocation6], 0 }
   0x2   :  { %9 = vsyncpa [#allocation4], 0  ;;  %s14_s11 = sshll.u32 %s396_s0, 4  ;;  %s344_s12 = smov [#allocation2]   ;;  %s15_s11 = int_to_ptr.hbm [resolvable:$true] %s14_s11 }
   0x3   :  { %s16_s13 = sshll.u32 %s344_s12, 4  ;;  %s27_s16 = sshll.u32 %s397_s1, 4  ;;  %s17_s13 = int_to_ptr.vmem [resolvable:$true] %s16_s13  ;;  %s28_s16 = int_to_ptr.hbm [resolvable:$true] %s27_s16 }
   0x4   :  { %s345_s17 = smov 128   ;;  %s346_s18 = smov 8  }
   0x5   :  { %22 = dma.hbm_to_vmem [thread:$0]  %s15_s11, 256, %s17_s13, [#allocation3], %s345_s17, %s345_s17, %s346_s18  }
   0x6   :  { %s347_s19 = smov [#allocation5]  }
   0x7   :  { %s29_s20 = sshll.u32 %s347_s19, 4  ;;  %s30_s20 = int_to_ptr.vmem [resolvable:$true] %s29_s20 }
   0x8   :  { %35 = dma.hbm_to_vmem [thread:$0]  %s28_s16, 512, %s30_s20, [#allocation6], %s345_s17, %s345_s17, %s346_s18  }
   0x9   :  { %338 = dma.done.wait [#allocation3], 256  }
   0xa   :  { %339 = vsyncadd [#allocation3], 4294967040 }
   0xb   :  { %340 = dma.done.wait [#allocation6], 512  }
   0xc   :  { %341 = vsyncadd [#allocation6], 4294966784  ;;  %v49_v0 = vld [vmem:[#allocation5 + $0x18] sm:$0xff]  ;;  %v48_v1 = vld [vmem:[#allocation5 + $0x10] sm:$0xff]  ;;  %vm50_vm0 = vcmask 261120   ;;  %vm83_vm1 = vcmask 130048   ;;  %v137_v11 = vlaneseq }
   0xd   :  { %69 = vmatpush.msra.mxu0 %v49_v0  ;;  %v47_v2 = vld [vmem:[#allocation5 + $0x8] sm:$0xff]  ;;  %v46_v3 = vld [vmem:[#allocation5] sm:$0xff]  ;;  %v44_v4 = vld [vmem:[#allocation2] sm:$0xff]  ;;  %s348_s0 = smov 112   ;;  %s349_s1 = smov 96   ;;  %vm146_vm3 = vcmask 64512  }
   0xe   :  { %v45_v5 = vld [vmem:[#allocation2 + $0x8] sm:$0xff]  ;;  %v138_v12 = vshrl.u32 %v137_v11, 7  ;;  %v140_v13 = vand.u32 127, %v137_v11  ;;  %s350_s21 = smov [#allocation7]   ;;  %s229_s25 = sshll.u32 %s398_s2, 4  ;;  %s230_s25 = int_to_ptr.hbm [resolvable:$true] %s229_s25 }
   0xf   :  { %70 = vmatpush.msra.mxu0 %v48_v1  ;;  %s227_s22 = sshll.u32 %s350_s21, 4  ;;  %s228_s22 = int_to_ptr.vmem [resolvable:$true] %s227_s22 }
  0x10   :  { %vm141_vm2 = vcmp.le.s32.totalorder %v140_v13, %v138_v12 }
  0x11   :  { %71 = vmatpush.msra.mxu0 %v47_v2 }
  0x13   :  { %72 = vmatpush.msra.mxu0 %v46_v3 }
  0x14   :  { %243 = vmatmul.msk.f32.vlgmr.msra.gmra.mxu0 %vm50_vm0, %v44_v4 }
  0x1c   :  { %244 = vmatmul.msk.f32.gmra.mxu0 %vm50_vm0, %v45_v5 }
  0x91   :  { %v74_v6 = vpop.f32.mrf.mxu0 }
  0x92   :  { %81 = vrot.lane.b32.xlu0 %v74_v6, %s348_s0  ;;  %245 = vmatpush.xpose.msk.msra.mxu1 %vm83_vm1, %v74_v6 }
  0x99   :  { %v77_v7 = vpop.f32.mrf.mxu0 }
  0x9a   :  { %109 = vrot.lane.b32.xlu0 %v77_v7, %s348_s0  ;;  %247 = vmatpush.xpose.msk.msra.mxu2 %vm83_vm1, %v77_v7 }
  0xa2   :  { %169 = vrot.lane.b32.xlu0 %v74_v6, %s349_s1 }
 0x104   :  { %v82_v8 = vpop.permute.xlu0 %81 }
 0x105   :  { %246 = vmatmul.msk.f32.vlgmr.msra.gmra.mxu1 %vm83_vm1, %v82_v8 }
 0x10c   :  { %v110_v9 = vpop.permute.xlu0 %109 }
 0x10d   :  { %248 = vmatmul.msk.f32.vlgmr.msra.gmra.mxu2 %vm83_vm1, %v110_v9 }
 0x114   :  { %v170_v10 = vpop.permute.xlu0 %169 }
 0x115   :  { %190 = vmatpush.msra.mxu3 %v170_v10 }
 0x182   :  { %v105_v14 = vpop.f32.mrf.mxu1 }
 0x183   :  { %v135_v15 = vmul.f32 5.656854, %v105_v14 }
 0x185   :  { %v144_v16 = vsel %vm141_vm2, %v135_v15, -1e+30 }
 0x186   :  { %v147_v17 = vsel %vm146_vm3, %v144_v16, -inf }
 0x187   :  { %148 = vmax.xlane.f32.xlu1 %v147_v17 }
 0x190   :  { %v132_v18 = vpop.f32.mrf.mxu2 }
 0x191   :  { %v136_v19 = vmul.f32 5.656854, %v132_v18 }
 0x193   :  { %v145_v20 = vsel %vm141_vm2, %v136_v19, -1e+30 }
 0x194   :  { %v150_v21 = vsel %vm146_vm3, %v145_v20, -inf }
 0x195   :  { %151 = vmax.xlane.f32.xlu1 %v150_v21 }
 0x1ae   :  { %195 = vrot.lane.b32.xlu1 %v77_v7, %s349_s1 }
 0x1fa   :  { %v149_v22 = vpop.xlane.xlu1 %148 }
 0x1fb   :  { %v153_v23 = vsub.f32 %v144_v16, %v149_v22 }
 0x1fd   :  { %v155_v24 = vmul.f32 1.442695, %v153_v23 }
 0x1ff   :  { %258 = vpow2.f32 %v155_v24 }
 0x205   :  { %v259_v25 = vpop.eup %258 }
 0x206   :  { %v159_v26 = vsel %vm146_vm3, %v259_v25, 0.0 }
 0x207   :  { %160 = vadd.xlane.f32.xlu2 %v159_v26 }
 0x208   :  { %v152_v27 = vpop.xlane.xlu1 %151 }
 0x209   :  { %v154_v28 = vsub.f32 %v145_v20, %v152_v27 }
 0x20b   :  { %v157_v29 = vmul.f32 1.442695, %v154_v28 }
 0x20d   :  { %260 = vpow2.f32 %v157_v29 }
 0x213   :  { %v261_v30 = vpop.eup %260 }
 0x214   :  { %v162_v31 = vsel %vm146_vm3, %v261_v30, 0.0 }
 0x215   :  { %163 = vadd.xlane.f32.xlu2 %v162_v31 }
 0x220   :  { %v196_v32 = vpop.permute.xlu1 %195 }
 0x221   :  { %216 = vmatpush.msrb.mxu3 %v196_v32 }
 0x27a   :  { %v161_v33 = vpop.xlane.xlu2 %160 }
 0x27b   :  { %262 = vrcp.f32 %v161_v33 }
 0x281   :  { %v263_v34 = vpop.eup %262 }
 0x282   :  { %v167_v35 = vmul.f32 %v263_v34, %v259_v25 }
 0x284   :  { %249 = vmatmul.msk.f32.vlgmr.msra.gmra.mxu3 %vm146_vm3, %v167_v35 }
 0x288   :  { %v164_v36 = vpop.xlane.xlu2 %163 }
 0x289   :  { %264 = vrcp.f32 %v164_v36 }
 0x28f   :  { %v265_v37 = vpop.eup %264 }
 0x290   :  { %v168_v38 = vmul.f32 %v265_v37, %v261_v30 }
 0x292   :  { %250 = vmatmul.msk.f32.vlgmr.msrb.gmra.mxu3 %vm146_vm3, %v168_v38 }
 0x307   :  { %v192_v39 = vpop.f32.mrf.mxu3 }
 0x308   :  { %221 = vst.msk [vmem:[#allocation7] sm:$0xff] %vm83_vm1, %v192_v39 }
 0x315   :  { %v218_v40 = vpop.f32.mrf.mxu3 }
 0x316   :  { %222 = vst.msk [vmem:[#allocation7 + $0x8] sm:$0xff] %vm83_vm1, %v218_v40 }
 0x317   :  { %235 = dma.vmem_to_hbm [thread:$0]  %s228_s22, 256, %s230_s25, [#allocation4], %s345_s17, %s345_s17, %s346_s18  }
 0x318   :  { %342 = dma.done.wait [#allocation4], 256  }
 0x319   :  { %343 = vsyncadd [#allocation4], 4294967040 }
 0x31a   :  { %240 = vsyncpa [#allocation3], 1 }
 0x31b   :  { %241 = vsyncpa [#allocation6], 1 }
 0x31c   :  { %242 = vsyncpa [#allocation4], 1 }

</bundles_post_ra>
